<compile_context>
chip_gen: v7x
topology: tpu7x:2x2x1
jax: 0.10.0
libtpu: 0.0.40
codegen_flags: <defaults>
</compile_context>

<pallas_src>
import functools
import numpy as np

import jax
import jax.numpy as jnp
from jax import lax
from jax.experimental import pallas as pl
from jax.experimental.pallas import tpu as pltpu

# ---------------- tiny synthetic LLaMA-like config ----------------
VOCAB = 64
HIDDEN = 32
N_HEADS = 2
N_KV_HEADS = 1
HEAD_DIM = HIDDEN // N_HEADS               # 16 (divisible by 8, as get_hash_code requires)
GROUP = N_HEADS // N_KV_HEADS
QKV_DIM = (N_HEADS + 2 * N_KV_HEADS) * HEAD_DIM   # fused q|k|v output width = 64 lanes
INTER = 64
N_LAYERS = 2
EPS = 1e-6
ROPE_THETA = 10000.0
FIX_LAYERS = [0]                           # layer 0 has no hash params (is_fix_layer)
DRAFT_KWARGS = {"enable": True, "mask_out": 0.5, "min_remain": 4}


# ============================ in-kernel helpers ============================

def _rmsnorm(x, w):
    var = jnp.mean(x * x, axis=-1, keepdims=True)
    return (x * lax.rsqrt(var + EPS)) * w


def _rope(x, cos, sin, d):
    x1 = x[:, : d // 2]
    x2 = x[:, d // 2:]
    rot = jnp.concatenate([-x2, x1], axis=-1)
    return x * cos + rot * sin


# ============================ fused attention-block kernel ============================
# One grid point = one batch element. Does:
#   norm -> qkv matmul -> rope -> (hash codes) -> causal attention (GQA) -> o-proj -> +residual
def _attn_block_kernel(h_ref, ln_ref, wqkv_ref, cos_ref, sin_ref, wo_ref, *rest,
                       n_heads, n_kv, d, scale, has_hash):
    if has_hash:
        rot1_ref, rot2_ref, pack_ref, o_ref, k_ref, v_ref, kh_ref = rest
    else:
        o_ref, k_ref, v_ref = rest

    x = h_ref[0]                                             # (S, H) residual + norm input
    xn = _rmsnorm(x, ln_ref[...])
    qkv = jnp.dot(xn, wqkv_ref[...], preferred_element_type=jnp.float32)   # (S, QKV)

    cos = cos_ref[...]
    sin = sin_ref[...]
    s_len = x.shape[0]
    row = lax.broadcasted_iota(jnp.int32, (s_len, s_len), 0)
    col = lax.broadcasted_iota(jnp.int32, (s_len, s_len), 1)
    causal = col <= row                                      # prefill causal mask

    group = n_heads // n_kv
    head_outs = []
    for kvh in range(n_kv):
        k_h = _rope(qkv[:, (n_heads + kvh) * d:(n_heads + kvh + 1) * d], cos, sin, d)
        v_h = qkv[:, (n_heads + n_kv + kvh) * d:(n_heads + n_kv + kvh + 1) * d]
        k_ref[0, kvh] = k_h                                  # post-RoPE K cache
        v_ref[0, kvh] = v_h                                  # V cache

        if has_hash:
            # get_hash_code: silu(k @ rot1) @ rot2 > 0, bit-packed to bytes.
            # (relu1 is nn.SiLU() in the reference Decoder; strict > 0 threshold.)
            hc = jnp.dot(k_h, rot1_ref[kvh], preferred_element_type=jnp.float32)
            hc = hc * jax.nn.sigmoid(hc)
            hc = jnp.dot(hc, rot2_ref[kvh], preferred_element_type=jnp.float32)
            bits = (hc > 0).astype(jnp.float32)
            # bit packing as matmul with a power-of-two packing matrix (exact for <=255)
            kh_ref[0, kvh] = jnp.dot(bits, pack_ref[...], preferred_element_type=jnp.float32)

        for g in range(group):                               # GQA: q-heads share this kv head
            qh = kvh * group + g
            q_h = _rope(qkv[:, qh * d:(qh + 1) * d], cos, sin, d)
            # contract last dims of q and k directly (no in-kernel transpose)
            s = lax.dot_general(q_h, k_h, (((1,), (1,)), ((), ())),
                                preferred_element_type=jnp.float32) * scale
            s = jnp.where(causal, s, -1e30)
            m = jnp.max(s, axis=-1, keepdims=True)
            p = jnp.exp(s - m)
            p = p * pl.reciprocal(jnp.sum(p, axis=-1, keepdims=True), approx=True)
            head_outs.append(jnp.dot(p, v_h, preferred_element_type=jnp.float32))

    attn = jnp.concatenate(head_outs, axis=-1)               # (S, n_heads*d), heads in order
    o_ref[0] = x + jnp.dot(attn, wo_ref[...], preferred_element_type=jnp.float32)


def attention_block(h, ln1, wqkv, cos, sin, wo, rot1=None, rot2=None, packm=None):
    b, s, hidden = h.shape
    has_hash = rot1 is not None
    kern = functools.partial(_attn_block_kernel, n_heads=N_HEADS, n_kv=N_KV_HEADS,
                             d=HEAD_DIM, scale=1.0 / float(np.sqrt(HEAD_DIM)),
                             has_hash=has_hash)

    in_specs = [
        pl.BlockSpec((1, s, hidden), lambda i: (i, 0, 0)),              # h (norm in + residual)
        pl.BlockSpec((1, hidden), lambda i: (0, 0)),                    # ln1
        pl.BlockSpec((hidden, QKV_DIM), lambda i: (0, 0)),              # fused wq|wk|wv
        pl.BlockSpec((s, HEAD_DIM), lambda i: (0, 0)),                  # cos
        pl.BlockSpec((s, HEAD_DIM), lambda i: (0, 0)),                  # sin
        pl.BlockSpec((N_HEADS * HEAD_DIM, hidden), lambda i: (0, 0)),   # wo
    ]
    inputs = [h, ln1.reshape(1, hidden), wqkv, cos, sin, wo]

    out_shape = [
        jax.ShapeDtypeStruct((b, s, hidden), jnp.float32),                       # new hidden
        jax.ShapeDtypeStruct((b, N_KV_HEADS, s, HEAD_DIM), jnp.float32),         # K cache
        jax.ShapeDtypeStruct((b, N_KV_HEADS, s, HEAD_DIM), jnp.float32),         # V cache
    ]
    out_specs = [
        pl.BlockSpec((1, s, hidden), lambda i: (i, 0, 0)),
        pl.BlockSpec((1, N_KV_HEADS, s, HEAD_DIM), lambda i: (i, 0, 0, 0)),
        pl.BlockSpec((1, N_KV_HEADS, s, HEAD_DIM), lambda i: (i, 0, 0, 0)),
    ]

    if has_hash:
        in_specs += [
            pl.BlockSpec((N_KV_HEADS, HEAD_DIM, HEAD_DIM), lambda i: (0, 0, 0)),
            pl.BlockSpec((N_KV_HEADS, HEAD_DIM, HEAD_DIM), lambda i: (0, 0, 0)),
            pl.BlockSpec((HEAD_DIM, HEAD_DIM // 8), lambda i: (0, 0)),
        ]
        inputs += [rot1, rot2, packm]
        out_shape.append(jax.ShapeDtypeStruct((b, N_KV_HEADS, s, HEAD_DIM // 8), jnp.float32))
        out_specs.append(pl.BlockSpec((1, N_KV_HEADS, s, HEAD_DIM // 8),
                                      lambda i: (i, 0, 0, 0)))

    return pl.pallas_call(
        kern,
        out_shape=tuple(out_shape),
        grid=(b,),
        in_specs=in_specs,
        out_specs=tuple(out_specs),
        compiler_params=pltpu.CompilerParams(dimension_semantics=("parallel",)),
    )(*inputs)


# ============================ fused MLP-block kernel ============================
# norm -> gate/up matmuls -> silu(gate)*up -> down matmul -> + residual
def _mlp_block_kernel(h_ref, ln_ref, wg_ref, wu_ref, wd_ref, o_ref):
    x = h_ref[...]
    xn = _rmsnorm(x, ln_ref[...])
    g = jnp.dot(xn, wg_ref[...], preferred_element_type=jnp.float32)
    u = jnp.dot(xn, wu_ref[...], preferred_element_type=jnp.float32)
    a = (g * jax.nn.sigmoid(g)) * u
    o_ref[...] = x + jnp.dot(a, wd_ref[...], preferred_element_type=jnp.float32)


def mlp_block(h2d, ln2, wg, wu, wd):
    n, hidden = h2d.shape
    inter = wg.shape[1]
    row_tile = 8 if (n % 8 == 0 and n >= 8) else n
    return pl.pallas_call(
        _mlp_block_kernel,
        out_shape=jax.ShapeDtypeStruct((n, hidden), jnp.float32),
        grid=(n // row_tile,),
        in_specs=[
            pl.BlockSpec((row_tile, hidden), lambda i: (i, 0)),
            pl.BlockSpec((1, hidden), lambda i: (0, 0)),
            pl.BlockSpec((hidden, inter), lambda i: (0, 0)),
            pl.BlockSpec((hidden, inter), lambda i: (0, 0)),
            pl.BlockSpec((inter, hidden), lambda i: (0, 0)),
        ],
        out_specs=pl.BlockSpec((row_tile, hidden), lambda i: (i, 0)),
        compiler_params=pltpu.CompilerParams(dimension_semantics=("parallel",)),
    )(h2d, ln2.reshape(1, hidden), wg, wu, wd)


# ============================ fused final norm + lm_head ============================
def _norm_head_kernel(h_ref, ln_ref, w_ref, o_ref):
    xn = _rmsnorm(h_ref[...], ln_ref[...])
    o_ref[...] = jnp.dot(xn, w_ref[...], preferred_element_type=jnp.float32)


def norm_head(h2d, norm_w, lm_head_w):
    n, hidden = h2d.shape
    vocab = lm_head_w.shape[1]
    row_tile = 8 if (n % 8 == 0 and n >= 8) else n
    return pl.pallas_call(
        _norm_head_kernel,
        out_shape=jax.ShapeDtypeStruct((n, vocab), jnp.float32),
        grid=(n // row_tile,),
        in_specs=[
            pl.BlockSpec((row_tile, hidden), lambda i: (i, 0)),
            pl.BlockSpec((1, hidden), lambda i: (0, 0)),
            pl.BlockSpec((hidden, vocab), lambda i: (0, 0)),
        ],
        out_specs=pl.BlockSpec((row_tile, vocab), lambda i: (i, 0)),
        compiler_params=pltpu.CompilerParams(dimension_semantics=("parallel",)),
    )(h2d, norm_w.reshape(1, hidden), lm_head_w)


# ============================ plain-JAX / numpy glue ============================

def rope_cos_sin(seq_len, dim):
    inv_freq = 1.0 / (ROPE_THETA ** (np.arange(0, dim, 2, dtype=np.float32) / dim))
    t = np.arange(seq_len, dtype=np.float32)
    freqs = np.outer(t, inv_freq)
    emb = np.concatenate([freqs, freqs], axis=-1)
    return jnp.asarray(np.cos(emb)), jnp.asarray(np.sin(emb))


def _pack_matrix(d):
    pm = np.zeros((d, d // 8), dtype=np.float32)
    for j in range(d // 8):
        for i in range(8):
            pm[j * 8 + i, j] = float(1 << i)
    return jnp.asarray(pm)


def random_rotation_matrices(seed, hkv, d):
    """QR-based random rotation matrices (matches random_rotation_matrix)."""
    rng = np.random.RandomState(seed)
    mats = []
    for _ in range(hkv):
        m = rng.randn(d, d).astype(np.float64)
        q, _ = np.linalg.qr(m)
        if np.linalg.det(q) < 0:
            q[:, 0] *= -1
        mats.append(q.astype(np.float32))
    return jnp.asarray(np.stack(mats, axis=0))       # (Hkv, D, D)


def init_params(key):
    def w(k, shape, scale=0.05):
        return scale * jax.random.normal(k, shape, dtype=jnp.float32)

    keys = jax.random.split(key, 4 + 8 * N_LAYERS)
    ki = iter(range(len(keys)))
    params = {
        "embed": w(keys[next(ki)], (VOCAB, HIDDEN), 0.02),
        "norm": jnp.ones((HIDDEN,), jnp.float32),
        "lm_head": w(keys[next(ki)], (HIDDEN, VOCAB)),
        "layers": [],
    }
    for li in range(N_LAYERS):
        wq = w(keys[next(ki)], (HIDDEN, N_HEADS * HEAD_DIM))
        wk = w(keys[next(ki)], (HIDDEN, N_KV_HEADS * HEAD_DIM))
        wv = w(keys[next(ki)], (HIDDEN, N_KV_HEADS * HEAD_DIM))
        layer = {
            "ln1": jnp.ones((HIDDEN,), jnp.float32),
            "ln2": jnp.ones((HIDDEN,), jnp.float32),
            "wqkv": jnp.concatenate([wq, wk, wv], axis=1),   # fused QKV weight
            "wo": w(keys[next(ki)], (N_HEADS * HEAD_DIM, HIDDEN)),
            "wg": w(keys[next(ki)], (HIDDEN, INTER)),
            "wu": w(keys[next(ki)], (HIDDEN, INTER)),
            "wd": w(keys[next(ki)], (INTER, HIDDEN)),
        }
        if li not in FIX_LAYERS:
            layer["rot1"] = random_rotation_matrices(1000 + li, N_KV_HEADS, HEAD_DIM)
            layer["rot2"] = random_rotation_matrices(2000 + li, N_KV_HEADS, HEAD_DIM)
        params["layers"].append(layer)
    return params


def decoder_forward(params, input_ids):
    """Prefill forward: logits, kv_cache (list of (k,v)), k_hash_cache (list)."""
    b, s = input_ids.shape
    h = jnp.take(params["embed"], input_ids, axis=0)          # (B, S, H)
    cos, sin = rope_cos_sin(s, HEAD_DIM)
    packm = _pack_matrix(HEAD_DIM)

    kv_cache, k_hash_cache = [], []
    for li, layer in enumerate(params["layers"]):
        has_hash = DRAFT_KWARGS["enable"] and (li not in FIX_LAYERS)
        if has_hash:
            h, k, v, kh = attention_block(h, layer["ln1"], layer["wqkv"], cos, sin,
                                          layer["wo"], layer["rot1"], layer["rot2"], packm)
            kh = kh.astype(jnp.uint8)     # tiny cast; packed values are exact in f32
        else:
            h, k, v = attention_block(h, layer["ln1"], layer["wqkv"], cos, sin, layer["wo"])
            kh = None
        kv_cache.append((k, v))
        k_hash_cache.append(kh)

        h = mlp_block(h.reshape(b * s, HIDDEN), layer["ln2"],
                      layer["wg"], layer["wu"], layer["wd"]).reshape(b, s, HIDDEN)

    logits = norm_head(h.reshape(b * s, HIDDEN), params["norm"], params["lm_head"])
    logits = logits.reshape(b, s, VOCAB).astype(jnp.float32)
    return logits, kv_cache, k_hash_cache


# ============================ driver ============================

if __name__ == "__main__":
    key = jax.random.PRNGKey(0)
    key_params, key_ids = jax.random.split(key)

    params = init_params(key_params)

    B, S = 2, 8
    input_ids = jax.random.randint(key_ids, (B, S), 0, VOCAB, dtype=jnp.int32)

    logits, kv_cache, k_hash_cache = decoder_forward(params, input_ids)

    jax.block_until_ready(logits)
    for (kk, vv) in kv_cache:
        jax.block_until_ready(kk)
        jax.block_until_ready(vv)
    for kh in k_hash_cache:
        if kh is not None:
            jax.block_until_ready(kh)

    assert logits.shape == (B, S, VOCAB)
    assert kv_cache[0][0].shape == (B, N_KV_HEADS, S, HEAD_DIM)
    assert kv_cache[0][1].shape == (B, N_KV_HEADS, S, HEAD_DIM)
    assert k_hash_cache[0] is None                     # layer 0 is a fix layer
    assert k_hash_cache[1].shape == (B, N_KV_HEADS, S, HEAD_DIM // 8)
    assert k_hash_cache[1].dtype == jnp.uint8

    print("KERNEL_OK")
</pallas_src>

<mosaic_0001>
module attributes {stable_mosaic.version = 11 : i64} {
  func.func @_attn_block_kernel(%arg0: i32, %arg1: memref<1x8x32xf32, #tpu.memory_space<vmem>>, %arg2: memref<1x32xf32, #tpu.memory_space<vmem>>, %arg3: memref<32x64xf32, #tpu.memory_space<vmem>>, %arg4: memref<8x16xf32, #tpu.memory_space<vmem>>, %arg5: memref<8x16xf32, #tpu.memory_space<vmem>>, %arg6: memref<32x32xf32, #tpu.memory_space<vmem>>, %arg7: memref<1x8x32xf32, #tpu.memory_space<vmem>>, %arg8: memref<1x1x8x16xf32, #tpu.memory_space<vmem>>, %arg9: memref<1x1x8x16xf32, #tpu.memory_space<vmem>>) attributes {dimension_semantics = [#tpu.dimension_semantics<parallel>], iteration_bounds = array<i64: 2>, scalar_prefetch = 0 : i64, scratch_operands = 0 : i64, tpu.core_type = #tpu.core_type<tc>, window_params = [{transform_indices = @transform_0, window_bounds = array<i64: 1, 8, 32>}, {pipeline_mode = #tpu.pipeline_mode<synchronous>, transform_indices = @transform_1, window_bounds = array<i64: 1, 32>}, {pipeline_mode = #tpu.pipeline_mode<synchronous>, transform_indices = @transform_2, window_bounds = array<i64: 32, 64>}, {pipeline_mode = #tpu.pipeline_mode<synchronous>, transform_indices = @transform_3, window_bounds = array<i64: 8, 16>}, {pipeline_mode = #tpu.pipeline_mode<synchronous>, transform_indices = @transform_4, window_bounds = array<i64: 8, 16>}, {pipeline_mode = #tpu.pipeline_mode<synchronous>, transform_indices = @transform_5, window_bounds = array<i64: 32, 32>}, {transform_indices = @transform_6, window_bounds = array<i64: 1, 8, 32>}, {transform_indices = @transform_7, window_bounds = array<i64: 1, 1, 8, 16>}, {transform_indices = @transform_8, window_bounds = array<i64: 1, 1, 8, 16>}]} {
    %c0 = arith.constant 0 : index
    %c0_0 = arith.constant 0 : index
    %c0_1 = arith.constant 0 : index
    %0 = vector.load %arg1[%c0, %c0_0, %c0_1] : memref<1x8x32xf32, #tpu.memory_space<vmem>>, vector<1x8x32xf32>
    %1 = vector.shape_cast %0 : vector<1x8x32xf32> to vector<8x32xf32>
    %c0_2 = arith.constant 0 : index
    %c0_3 = arith.constant 0 : index
    %2 = vector.load %arg2[%c0_2, %c0_3] : memref<1x32xf32, #tpu.memory_space<vmem>>, vector<1x32xf32>
    %3 = arith.mulf %1, %1 : vector<8x32xf32>
    %cst = arith.constant dense<0.000000e+00> : vector<8xf32>
    %4 = vector.multi_reduction <add>, %3, %cst [1] : vector<8x32xf32> to vector<8xf32>
    %5 = vector.shape_cast %4 : vector<8xf32> to vector<8x1xf32>
    %cst_4 = arith.constant 3.200000e+01 : f32
    %6 = vector.broadcast %cst_4 : f32 to vector<8x1xf32>
    %7 = arith.divf %5, %6 : vector<8x1xf32>
    %cst_5 = arith.constant 9.99999997E-7 : f32
    %8 = vector.broadcast %cst_5 : f32 to vector<8x1xf32>
    %9 = arith.addf %7, %8 : vector<8x1xf32>
    %10 = math.rsqrt %9 : vector<8x1xf32>
    %11 = vector.broadcast %10 : vector<8x1xf32> to vector<8x32xf32>
    %12 = arith.mulf %1, %11 : vector<8x32xf32>
    %13 = vector.broadcast %2 : vector<1x32xf32> to vector<8x32xf32>
    %14 = arith.mulf %12, %13 : vector<8x32xf32>
    %c0_6 = arith.constant 0 : index
    %c0_7 = arith.constant 0 : index
    %15 = vector.load %arg3[%c0_6, %c0_7] : memref<32x64xf32, #tpu.memory_space<vmem>>, vector<32x64xf32>
    %cst_8 = arith.constant dense<0.000000e+00> : vector<8x64xf32>
    %16 = tpu.matmul %14, %15, %cst_8 {dimension_numbers = #tpu.dot_dimension_numbers<[1], [0], [0], [1], [0, 0, 1, 1], [], []>} : vector<8x32xf32>, vector<32x64xf32>, vector<8x64xf32> -> vector<8x64xf32>
    %c0_9 = arith.constant 0 : index
    %c0_10 = arith.constant 0 : index
    %17 = vector.load %arg4[%c0_9, %c0_10] : memref<8x16xf32, #tpu.memory_space<vmem>>, vector<8x16xf32>
    %c0_11 = arith.constant 0 : index
    %c0_12 = arith.constant 0 : index
    %18 = vector.load %arg5[%c0_11, %c0_12] : memref<8x16xf32, #tpu.memory_space<vmem>>, vector<8x16xf32>
    %19 = tpu.iota {dimensions = array<i32: 0>} : vector<8x8xi32>
    %20 = tpu.iota {dimensions = array<i32: 1>} : vector<8x8xi32>
    %21 = arith.cmpi sle, %20, %19 : vector<8x8xi32>
    %22 = vector.extract_strided_slice %16 {offsets = [0, 32], sizes = [8, 16], strides = [1, 1]} : vector<8x64xf32> to vector<8x16xf32>
    %23 = vector.extract_strided_slice %22 {offsets = [0, 0], sizes = [8, 8], strides = [1, 1]} : vector<8x16xf32> to vector<8x8xf32>
    %24 = vector.extract_strided_slice %22 {offsets = [0, 8], sizes = [8, 8], strides = [1, 1]} : vector<8x16xf32> to vector<8x8xf32>
    %cst_13 = arith.constant 0.000000e+00 : f32
    %25 = vector.broadcast %cst_13 : f32 to vector<8x8xf32>
    %26 = arith.subf %25, %24 : vector<8x8xf32>
    %27 = tpu.concatenate %26, %23 in 1 : vector<8x8xf32>, vector<8x8xf32> -> vector<8x16xf32>
    %28 = arith.mulf %22, %17 : vector<8x16xf32>
    %29 = arith.mulf %27, %18 : vector<8x16xf32>
    %30 = arith.addf %28, %29 : vector<8x16xf32>
    %31 = vector.extract_strided_slice %16 {offsets = [0, 48], sizes = [8, 16], strides = [1, 1]} : vector<8x64xf32> to vector<8x16xf32>
    %c0_14 = arith.constant 0 : index
    %c0_15 = arith.constant 0 : index
    %c0_16 = arith.constant 0 : index
    %c0_17 = arith.constant 0 : index
    %32 = vector.load %arg8[%c0_14, %c0_15, %c0_16, %c0_17] : memref<1x1x8x16xf32, #tpu.memory_space<vmem>>, vector<1x1x8x16xf32>
    %33 = vector.shape_cast %32 : vector<1x1x8x16xf32> to vector<8x16xf32>
    %34 = vector.shape_cast %30 : vector<8x16xf32> to vector<1x1x8x16xf32>
    tpu.vector_store %arg8[%c0_14, %c0_15, %c0_16, %c0_17], %34 {strides = array<i32>} : memref<1x1x8x16xf32, #tpu.memory_space<vmem>>, vector<1x1x8x16xf32>,
    %c0_18 = arith.constant 0 : index
    %c0_19 = arith.constant 0 : index
    %c0_20 = arith.constant 0 : index
    %c0_21 = arith.constant 0 : index
    %35 = vector.load %arg9[%c0_18, %c0_19, %c0_20, %c0_21] : memref<1x1x8x16xf32, #tpu.memory_space<vmem>>, vector<1x1x8x16xf32>
    %36 = vector.shape_cast %35 : vector<1x1x8x16xf32> to vector<8x16xf32>
    %37 = vector.shape_cast %31 : vector<8x16xf32> to vector<1x1x8x16xf32>
    tpu.vector_store %arg9[%c0_18, %c0_19, %c0_20, %c0_21], %37 {strides = array<i32>} : memref<1x1x8x16xf32, #tpu.memory_space<vmem>>, vector<1x1x8x16xf32>,
    %38 = vector.extract_strided_slice %16 {offsets = [0, 0], sizes = [8, 16], strides = [1, 1]} : vector<8x64xf32> to vector<8x16xf32>
    %39 = vector.extract_strided_slice %38 {offsets = [0, 0], sizes = [8, 8], strides = [1, 1]} : vector<8x16xf32> to vector<8x8xf32>
    %40 = vector.extract_strided_slice %38 {offsets = [0, 8], sizes = [8, 8], strides = [1, 1]} : vector<8x16xf32> to vector<8x8xf32>
    %cst_22 = arith.constant 0.000000e+00 : f32
    %41 = vector.broadcast %cst_22 : f32 to vector<8x8xf32>
    %42 = arith.subf %41, %40 : vector<8x8xf32>
    %43 = tpu.concatenate %42, %39 in 1 : vector<8x8xf32>, vector<8x8xf32> -> vector<8x16xf32>
    %44 = arith.mulf %38, %17 : vector<8x16xf32>
    %45 = arith.mulf %43, %18 : vector<8x16xf32>
    %46 = arith.addf %44, %45 : vector<8x16xf32>
    %cst_23 = arith.constant dense<0.000000e+00> : vector<8x8xf32>
    %47 = tpu.matmul %46, %30, %cst_23 {dimension_numbers = #tpu.dot_dimension_numbers<[1], [1], [0], [0], [0, 0, 1, 0], [], []>} : vector<8x16xf32>, vector<8x16xf32>, vector<8x8xf32> -> vector<8x8xf32>
    %cst_24 = arith.constant 2.500000e-01 : f32
    %48 = vector.broadcast %cst_24 : f32 to vector<8x8xf32>
    %49 = arith.mulf %47, %48 : vector<8x8xf32>
    %cst_25 = arith.constant -1.000000e+30 : f32
    %50 = vector.broadcast %cst_25 : f32 to vector<8x8xf32>
    %51 = arith.select %21, %49, %50 : vector<8x8xi1>, vector<8x8xf32>
    %cst_26 = arith.constant dense<0xFF800000> : vector<8xf32>
    %52 = vector.multi_reduction <maximumf>, %51, %cst_26 [1] : vector<8x8xf32> to vector<8xf32>
    %53 = vector.shape_cast %52 : vector<8xf32> to vector<8x1xf32>
    %54 = vector.broadcast %53 : vector<8x1xf32> to vector<8x8xf32>
    %55 = arith.subf %51, %54 : vector<8x8xf32>
    %56 = math.exp %55 : vector<8x8xf32>
    %cst_27 = arith.constant dense<0.000000e+00> : vector<8xf32>
    %57 = vector.multi_reduction <add>, %56, %cst_27 [1] : vector<8x8xf32> to vector<8xf32>
    %58 = vector.shape_cast %57 : vector<8xf32> to vector<8x1xf32>
    %59 = tpu.reciprocal %58 {approx = true} : vector<8x1xf32> -> vector<8x1xf32>
    %60 = vector.broadcast %59 : vector<8x1xf32> to vector<8x8xf32>
    %61 = arith.mulf %56, %60 : vector<8x8xf32>
    %cst_28 = arith.constant dense<0.000000e+00> : vector<8x16xf32>
    %62 = tpu.matmul %61, %31, %cst_28 {dimension_numbers = #tpu.dot_dimension_numbers<[1], [0], [0], [1], [0, 0, 1, 1], [], []>} : vector<8x8xf32>, vector<8x16xf32>, vector<8x16xf32> -> vector<8x16xf32>
    %63 = vector.extract_strided_slice %16 {offsets = [0, 16], sizes = [8, 16], strides = [1, 1]} : vector<8x64xf32> to vector<8x16xf32>
    %64 = vector.extract_strided_slice %63 {offsets = [0, 0], sizes = [8, 8], strides = [1, 1]} : vector<8x16xf32> to vector<8x8xf32>
    %65 = vector.extract_strided_slice %63 {offsets = [0, 8], sizes = [8, 8], strides = [1, 1]} : vector<8x16xf32> to vector<8x8xf32>
    %cst_29 = arith.constant 0.000000e+00 : f32
    %66 = vector.broadcast %cst_29 : f32 to vector<8x8xf32>
    %67 = arith.subf %66, %65 : vector<8x8xf32>
    %68 = tpu.concatenate %67, %64 in 1 : vector<8x8xf32>, vector<8x8xf32> -> vector<8x16xf32>
    %69 = arith.mulf %63, %17 : vector<8x16xf32>
    %70 = arith.mulf %68, %18 : vector<8x16xf32>
    %71 = arith.addf %69, %70 : vector<8x16xf32>
    %cst_30 = arith.constant dense<0.000000e+00> : vector<8x8xf32>
    %72 = tpu.matmul %71, %30, %cst_30 {dimension_numbers = #tpu.dot_dimension_numbers<[1], [1], [0], [0], [0, 0, 1, 0], [], []>} : vector<8x16xf32>, vector<8x16xf32>, vector<8x8xf32> -> vector<8x8xf32>
    %cst_31 = arith.constant 2.500000e-01 : f32
    %73 = vector.broadcast %cst_31 : f32 to vector<8x8xf32>
    %74 = arith.mulf %72, %73 : vector<8x8xf32>
    %cst_32 = arith.constant -1.000000e+30 : f32
    %75 = vector.broadcast %cst_32 : f32 to vector<8x8xf32>
    %76 = arith.select %21, %74, %75 : vector<8x8xi1>, vector<8x8xf32>
    %cst_33 = arith.constant dense<0xFF800000> : vector<8xf32>
    %77 = vector.multi_reduction <maximumf>, %76, %cst_33 [1] : vector<8x8xf32> to vector<8xf32>
    %78 = vector.shape_cast %77 : vector<8xf32> to vector<8x1xf32>
    %79 = vector.broadcast %78 : vector<8x1xf32> to vector<8x8xf32>
    %80 = arith.subf %76, %79 : vector<8x8xf32>
    %81 = math.exp %80 : vector<8x8xf32>
    %cst_34 = arith.constant dense<0.000000e+00> : vector<8xf32>
    %82 = vector.multi_reduction <add>, %81, %cst_34 [1] : vector<8x8xf32> to vector<8xf32>
    %83 = vector.shape_cast %82 : vector<8xf32> to vector<8x1xf32>
    %84 = tpu.reciprocal %83 {approx = true} : vector<8x1xf32> -> vector<8x1xf32>
    %85 = vector.broadcast %84 : vector<8x1xf32> to vector<8x8xf32>
    %86 = arith.mulf %81, %85 : vector<8x8xf32>
    %cst_35 = arith.constant dense<0.000000e+00> : vector<8x16xf32>
    %87 = tpu.matmul %86, %31, %cst_35 {dimension_numbers = #tpu.dot_dimension_numbers<[1], [0], [0], [1], [0, 0, 1, 1], [], []>} : vector<8x8xf32>, vector<8x16xf32>, vector<8x16xf32> -> vector<8x16xf32>
    %88 = tpu.concatenate %62, %87 in 1 : vector<8x16xf32>, vector<8x16xf32> -> vector<8x32xf32>
    %c0_36 = arith.constant 0 : index
    %c0_37 = arith.constant 0 : index
    %89 = vector.load %arg6[%c0_36, %c0_37] : memref<32x32xf32, #tpu.memory_space<vmem>>, vector<32x32xf32>
    %cst_38 = arith.constant dense<0.000000e+00> : vector<8x32xf32>
    %90 = tpu.matmul %88, %89, %cst_38 {dimension_numbers = #tpu.dot_dimension_numbers<[1], [0], [0], [1], [0, 0, 1, 1], [], []>} : vector<8x32xf32>, vector<32x32xf32>, vector<8x32xf32> -> vector<8x32xf32>
    %91 = arith.addf %1, %90 : vector<8x32xf32>
    %c0_39 = arith.constant 0 : index
    %c0_40 = arith.constant 0 : index
    %c0_41 = arith.constant 0 : index
    %92 = vector.load %arg7[%c0_39, %c0_40, %c0_41] : memref<1x8x32xf32, #tpu.memory_space<vmem>>, vector<1x8x32xf32>
    %93 = vector.shape_cast %92 : vector<1x8x32xf32> to vector<8x32xf32>
    %94 = vector.shape_cast %91 : vector<8x32xf32> to vector<1x8x32xf32>
    tpu.vector_store %arg7[%c0_39, %c0_40, %c0_41], %94 {strides = array<i32>} : memref<1x8x32xf32, #tpu.memory_space<vmem>>, vector<1x8x32xf32>,
    return
  }
  func.func @transform_0(%arg0: i32) -> (i32, i32, i32) {
    %c0_i32 = arith.constant 0 : i32
    %c0_i32_0 = arith.constant 0 : i32
    %c0_i32_1 = arith.constant 0 : i32
    return %arg0, %c0_i32, %c0_i32_0 : i32, i32, i32
  }
  func.func @transform_1(%arg0: i32) -> (i32, i32) {
    %c0_i32 = arith.constant 0 : i32
    %c0_i32_0 = arith.constant 0 : i32
    %c0_i32_1 = arith.constant 0 : i32
    return %c0_i32, %c0_i32_0 : i32, i32
  }
  func.func @transform_2(%arg0: i32) -> (i32, i32) {
    %c0_i32 = arith.constant 0 : i32
    %c0_i32_0 = arith.constant 0 : i32
    %c0_i32_1 = arith.constant 0 : i32
    return %c0_i32, %c0_i32_0 : i32, i32
  }
  func.func @transform_3(%arg0: i32) -> (i32, i32) {
    %c0_i32 = arith.constant 0 : i32
    %c0_i32_0 = arith.constant 0 : i32
    %c0_i32_1 = arith.constant 0 : i32
    return %c0_i32, %c0_i32_0 : i32, i32
  }
  func.func @transform_4(%arg0: i32) -> (i32, i32) {
    %c0_i32 = arith.constant 0 : i32
    %c0_i32_0 = arith.constant 0 : i32
    %c0_i32_1 = arith.constant 0 : i32
    return %c0_i32, %c0_i32_0 : i32, i32
  }
  func.func @transform_5(%arg0: i32) -> (i32, i32) {
    %c0_i32 = arith.constant 0 : i32
    %c0_i32_0 = arith.constant 0 : i32
    %c0_i32_1 = arith.constant 0 : i32
    return %c0_i32, %c0_i32_0 : i32, i32
  }
  func.func @transform_6(%arg0: i32) -> (i32, i32, i32) {
    %c0_i32 = arith.constant 0 : i32
    %c0_i32_0 = arith.constant 0 : i32
    %c0_i32_1 = arith.constant 0 : i32
    return %arg0, %c0_i32, %c0_i32_0 : i32, i32, i32
  }
  func.func @transform_7(%arg0: i32) -> (i32, i32, i32, i32) {
    %c0_i32 = arith.constant 0 : i32
    %c0_i32_0 = arith.constant 0 : i32
    %c0_i32_1 = arith.constant 0 : i32
    %c0_i32_2 = arith.constant 0 : i32
    return %arg0, %c0_i32, %c0_i32_0, %c0_i32_1 : i32, i32, i32, i32
  }
  func.func @transform_8(%arg0: i32) -> (i32, i32, i32, i32) {
    %c0_i32 = arith.constant 0 : i32
    %c0_i32_0 = arith.constant 0 : i32
    %c0_i32_1 = arith.constant 0 : i32
    %c0_i32_2 = arith.constant 0 : i32
    return %arg0, %c0_i32, %c0_i32_0, %c0_i32_1 : i32, i32, i32, i32
  }
}

</mosaic_0001>

<bundles_post_ra>
// kernel: tpu_custom_call.1
= control target key start
LH: loop header
LB: loop body
LE: loop exit
PB: predicated region body
PF: predicated region fallthrough
CT: control target
= control target key end

     0   :  { %14 = vsyncpa [#allocation3], 0  ;;  %s2086_s0 = inlined_call_operand.hbm [shape: f32[2,8,32], index: 0, kind: input, shape index: {}]   ;;  %s2087_s1 = inlined_call_operand.vmem [shape: f32[1,32], index: 1, kind: input, shape index: {}]   ;;  %s2088_s2 = inlined_call_operand.hbm [shape: f32[32,64], index: 2, kind: input, shape index: {}]   ;;  %s2089_s3 = inlined_call_operand.vmem [shape: f32[8,16], index: 3, kind: input, shape index: {}]   ;;  %s2090_s4 = inlined_call_operand.hbm [shape: f32[8,16], index: 4, kind: input, shape index: {}]   ;;  %s2091_s5 = inlined_call_operand.hbm [shape: f32[32,32], index: 5, kind: input, shape index: {}]   ;;  %s2092_s6 = inlined_call_operand.hbm [shape: f32[2,8,32], index: 6, kind: output, shape index: {0}]   ;;  %s2093_s7 = inlined_call_operand.hbm [shape: f32[2,1,8,16], index: 7, kind: output, shape index: {1}]   ;;  %s2094_s8 = inlined_call_operand.hbm [shape: f32[2,1,8,16], index: 8, kind: output, shape index: {2}]  }
   0x1   :  { %16 = vsyncpa [#allocation3 + $0x1], 0 }
   0x2   :  { %17 = vsyncpa [#allocation6], 0 }
   0x3   :  { %18 = vsyncpa [#allocation9], 0 }
   0x4   :  { %19 = vsyncpa [#allocation4], 0 }
   0x5   :  { %21 = vsyncpa [#allocation4 + $0x1], 0 }
   0x6   :  { %22 = vsyncpa [#allocation12], 0 }
   0x7   :  { %24 = vsyncpa [#allocation12 + $0x1], 0  ;;  %s1691_s27 = smov 0   ;;  %s1693_s28 = smov 0  }
   0x8   :  { %s1695_s29 = smov 0   ;;  %s1697_s30 = smov 0  }
   0x9 LB: > { %2101 = sst [smem:[#allocation19_spill]] %s1611_s27  ;;  %s1712_s9 = sadd.s32 4294967295, %s1623_s30   ;;  %s1623_s30 = sphi %s1697_s30, %s2125_s30   ;;  %s1619_s29 = sphi %s1695_s29, %s2124_s29   ;;  %s1615_s28 = sphi %s1693_s28, %s2123_s28   ;;  %s1611_s27 = sphi %s1691_s27, %s2122_s27  }
   0xa   : > { %s2096_s10 = sadd.s32 4294967294, %s1623_s30   ;;  %p50_p0 = scmp.ne.s32.totalorder %s1615_s28, %s1611_s27 }
   0xb   : > { %p2095_p1 = scmp.eq.s32.totalorder %s1712_s9, 0  ;;  %p185_p3 = scmp.eq.s32.totalorder %s2096_s10, 1 }
   0xc   : > { %p1160_p5 = scmp.ge.s32.totalorder %s1623_s30, 1  ;;  %p244_p7 = scmp.lt.s32.totalorder %s1623_s30, 3 }
   0xd   : > { %p1723_p4 = por %p2095_p1, %p50_p0  ;;  %p1728_p6 = por %p185_p3, %p50_p0 }
   0xe   : > { %p1733_p8 = pnand %p1160_p5, %p244_p7  ;;  %s1625_s14 = smov [#allocation5]  }
   0xf   : > { %s2102_s11 = scalar_select %p1723_p4, 1, 0 }
  0x10   : > { %s2103_s12 = scalar_select %p1728_p6, 1, 0 }
  0x11   : > { %s2105_s13 = scalar_select %p1733_p8, 1, 0 }
  0x12   : > { %2104 = sst [smem:[#allocation20_spill]] %s2103_s12  ;;  %s259_s15 = sshll.u32 %s1625_s14, 4  ;;  %s1737_s15 = int_to_ptr.vmem [resolvable:$true] %s259_s15 }
  0x13   : > { %p1284_p9 = pneg %p1733_p8  ;;  %s1626_s17 = smov [#allocation7]  }
  0x14   : > { %s276_s18 = sshll.u32 %s1626_s17, 4  ;;  %s1627_s19 = smov [#allocation8]   ;;  %s1748_s18 = int_to_ptr.vmem [resolvable:$true] %s276_s18 }
  0x15   : > { %p1744_p11 = pnand %p1284_p9, %p2095_p1  ;;  %s1750_s20 = sshll.u32 %s1627_s19, 4  ;;  %s287_s20 = int_to_ptr.vmem [resolvable:$true] %s1750_s20 }
  0x16   : > { %s1375_s23 = scalar_lea.hbm %s2088_s2, 512 }
  0x17   : > { %p1376_p12 = scmp.ne.s32.totalorder %s2088_s2, %s1375_s23  ;;  %p1760_p13 = pneg %p1744_p11 }
  0x18   : > { %p1382_p5 = scmp.lt.u32.totalorder %s1375_s23, %s2088_s2 }
  0x19   : > { %p1378_p0 = pnand %p1760_p13, %p1376_p12 }
  0x1b   : > { %p1379_p3 = pneg %p1378_p0 }
  0x1d   : > { %p1384_p7 = pnand %p1382_p5, %p1379_p3 }
  0x1f   : > { %1387 = shalt.err (!%p1384_p7)
}
  0x20   : > { %s1388_s19 = scalar_lea.vmem %s1737_s15, 512  ;;  %p1396_p2 = scmp.lt.s32.totalorder %s1737_s15, %s1737_s15 }
  0x21   : > { %p1389_p9 = scmp.ne.s32.totalorder %s1737_s15, %s1388_s19  ;;  %p1397_p6 = scmp.lt.s32.totalorder %s1388_s19, %s1388_s19 }
  0x23   : > { %p1391_p10 = pnand %p1389_p9, %p1760_p13  ;;  %p1398_p12 = por %p1397_p6, %p1396_p2 }
  0x25   : > { %p1392_p1 = pneg %p1391_p10 }
  0x27   : > { %p1399_p0 = pnand %p1398_p12, %p1392_p1 }
  0x29   : > { %1402 = shalt.err (!%p1399_p0)
}
  0x2a   : > { %s1628_s21 = smov 128   ;;  %s1629_s22 = smov 8  }
  0x2b   : > { %1287 = dma.hbm_to_vmem [thread:$0]  (!%p1744_p11), %s2088_s2, 512, %s1737_s15, [#allocation6], %s1628_s21, %s1628_s21, %s1629_s22  }
  0x2c   : > { %s1403_s17 = scalar_lea.hbm %s2090_s4, 128 }
  0x2d   : > { %p1404_p1 = scmp.ne.s32.totalorder %s2090_s4, %s1403_s17  ;;  %p1410_p10 = scmp.lt.u32.totalorder %s1403_s17, %s2090_s4 }
  0x2f   : > { %p1406_p2 = pnand %p1404_p1, %p1760_p13 }
  0x31   : > { %p1407_p6 = pneg %p1406_p2 }
  0x33   : > { %p1412_p3 = pnand %p1410_p10, %p1407_p6 }
  0x35   : > { %1415 = shalt.err (!%p1412_p3)
}
  0x36   : > { %s1416_s15 = scalar_lea.vmem %s1748_s18, 128  ;;  %p1424_p12 = scmp.lt.s32.totalorder %s1748_s18, %s1748_s18 }
  0x37   : > { %p1417_p5 = scmp.ne.s32.totalorder %s1748_s18, %s1416_s15  ;;  %p1425_p0 = scmp.lt.s32.totalorder %s1416_s15, %s1416_s15 }
  0x39   : > { %p1419_p7 = pnand %p1417_p5, %p1760_p13  ;;  %p1426_p1 = por %p1425_p0, %p1424_p12 }
  0x3b   : > { %p1420_p9 = pneg %p1419_p7 }
  0x3d   : > { %p1427_p2 = pnand %p1426_p1, %p1420_p9 }
  0x3f   : > { %1430 = shalt.err (!%p1427_p2)
}
  0x40   : > { %1290 = dma.hbm_to_vmem [thread:$0]  (!%p1744_p11), %s2090_s4, 128, %s1748_s18, [#allocation6]  }
  0x41   : > { %s1431_s24 = scalar_lea.hbm %s2091_s5, 512 }
  0x42   : > { %p1432_p6 = scmp.ne.s32.totalorder %s2091_s5, %s1431_s24  ;;  %p1438_p5 = scmp.lt.u32.totalorder %s1431_s24, %s2091_s5 }
  0x44   : > { %p1434_p10 = pnand %p1432_p6, %p1760_p13 }
  0x46   : > { %p1435_p3 = pneg %p1434_p10 }
  0x48   : > { %p1440_p7 = pnand %p1438_p5, %p1435_p3 }
  0x4a   : > { %1443 = shalt.err (!%p1440_p7)
}
  0x4b   : > { %s1444_s15 = scalar_lea.vmem %s287_s20, 512  ;;  %p1452_p1 = scmp.lt.s32.totalorder %s287_s20, %s287_s20 }
  0x4c   : > { %p1445_p9 = scmp.ne.s32.totalorder %s287_s20, %s1444_s15  ;;  %p1453_p2 = scmp.lt.s32.totalorder %s1444_s15, %s1444_s15 }
  0x4e   : > { %p1447_p12 = pnand %p1445_p9, %p1760_p13  ;;  %p1454_p4 = por %p1453_p2, %p1452_p1 }
  0x50   : > { %p1448_p0 = pneg %p1447_p12 }
  0x52   : > { %p1455_p8 = pnand %p1454_p4, %p1448_p0 }
  0x54   : > { %1458 = shalt.err (!%p1455_p8)
}
  0x55   : > { %1293 = dma.hbm_to_vmem [thread:$0]  (!%p1744_p11), %s2091_s5, 512, %s287_s20, [#allocation9], %s1628_s21, %s1628_s21, %s1629_s22  }
  0x56   : > { %s1830_s26 = sadd.s32 1, %s1623_s30   ;;  %s37_s10 = sadd.s32 1, %s1619_s29 }
  0x57   : > { %s34_s16 = ssub.s32 %s1623_s30, %s1830_s26  ;;  %p44_p8 = scmp.ne.s32.totalorder %s1619_s29, %s1615_s28 }
  0x58   : > { %p35_p4 = scmp.eq.s32.totalorder %s34_s16, 0  ;;  %p45_p13 = scmp.eq.s32.totalorder %s1623_s30, 0 }
  0x59   : > { %p1311_p6 = scmp.lt.s32.totalorder %s1623_s30, 2  ;;  %p2108_p3 = scmp.eq.s32.totalorder %s1712_s9, 1 }
  0x5a   : > { %s1840_s12 = scalar_select %p35_p4, %s1619_s29, %s37_s10  }
  0x5b   : > { %p46_p10 = por %p45_p13, %p44_p8  ;;  %p1844_p5 = por %p2108_p3, %p44_p8 }
  0x5c   : > { %s300_s24 = sand.u32 1, %s1619_s29   ;;  %s1166_s25 = sshll.u32 %s1623_s30, 7 }
  0x5d   : > { %s1165_s20 = sshll.u32 %s300_s24, 3  ;;  %s1853_s14 = scalar_lea.hbm %s2086_s0, %s1166_s25 }
  0x5e   : > { %s304_s17 = scalar_lea.vmem [#allocation2], %s1165_s20  ;;  %p1855_p11 = pnand %p1311_p6, %p46_p10 }
  0x5f   : > { %s311_s19 = sshll.u32 %s304_s17, 4  ;;  %s301_s18 = scalar_lea.sflag [#allocation3], %s300_s24  ;;  %s1859_s19 = int_to_ptr.vmem [resolvable:$true] %s311_s19 }
  0x60   : > { %s1459_s27 = scalar_lea.hbm %s1853_s14, 128  ;;  %p1461_p9 = pneg %p1855_p11 }
  0x61   : > { %p1460_p7 = scmp.ne.s32.totalorder %s1853_s14, %s1459_s27  ;;  %s1464_s25 = scalar_lea.hbm %s2086_s0, 256 }
  0x62   : > { %p1465_p1 = scmp.lt.u32.totalorder %s1853_s14, %s2086_s0  ;;  %p1466_p2 = scmp.lt.u32.totalorder %s1464_s25, %s1459_s27 }
  0x63   : > { %p1462_p12 = pnand %p1461_p9, %p1460_p7  ;;  %p1468_p8 = scmp.lt.u32.totalorder %s1459_s27, %s1853_s14 }
  0x64   : > { %p1467_p4 = por %p1466_p2, %p1465_p1 }
  0x65   : > { %p1463_p0 = pneg %p1462_p12 }
  0x66   : > { %p1469_p13 = por %p1468_p8, %p1467_p4 }
  0x68   : > { %p1470_p6 = pnand %p1469_p13, %p1463_p0 }
  0x6a   : > { %1473 = shalt.err (!%p1470_p6)
}
  0x6b   : > { %s1474_s24 = scalar_lea.vmem %s1859_s19, 128  ;;  %s1630_s22 = smov [#allocation2]  }
  0x6c   : > { %p1475_p10 = scmp.ne.s32.totalorder %s1859_s19, %s1474_s24  ;;  %s1479_s17 = sshll.u32 %s1630_s22, 4  ;;  %s1480_s17 = int_to_ptr.vmem [resolvable:$false] %s1479_s17 }
  0x6d   : > { %s1481_s16 = scalar_lea.vmem %s1480_s17, 256  ;;  %p1482_p12 = scmp.lt.s32.totalorder %s1859_s19, %s1480_s17 }
  0x6e   : > { %p1477_p3 = pnand %p1475_p10, %p1461_p9  ;;  %p1483_p1 = scmp.lt.s32.totalorder %s1481_s16, %s1474_s24 }
  0x70   : > { %p1478_p7 = pneg %p1477_p3  ;;  %p1484_p2 = por %p1483_p1, %p1482_p12 }
  0x72   : > { %p1485_p4 = pnand %p1484_p2, %p1478_p7 }
  0x74   : > { %1488 = shalt.err (!%p1485_p4)
}
  0x75   : > { %1297 = dma.hbm_to_vmem [thread:$0]  (!%p1855_p11), %s1853_s14, 128, %s1859_s19, %s301_s18  }
  0x76   : > { %p2111_p0 = scmp.ne.s32.totalorder %s2105_s13, 0 }
  0x77   : > { %s1889_s27 = sand.u32 (!%p2111_p0), 1, %s1615_s28   ;;  %p2112_p9 = scmp.ne.s32.totalorder (!%p2111_p0), %s2102_s11, 0 }
  0x78   : > { %320 = sbr.rel (%p2111_p0) target bundleno = 2485 (0x9b5), region = 44  ;;  %s1892_s10 = sshll.u32 (!%p2111_p0), %s1889_s27, 3 }
  0x79   : > { %s323_s25 = scalar_lea.sflag (!%p2111_p0), [#allocation3], %s1889_s27  ;;  %s326_s20 = scalar_lea.vmem (!%p2111_p0), [#allocation2], %s1892_s10 }
  0x7f   : > { %1590 = dma.done.wait (%p2112_p9), %s323_s25, 128  }
  0x80   : > { %1592 = vsyncadd (%p2112_p9), %s323_s25, 4294967168  ;;  %p2113_p11 = scmp.eq.s32.totalorder %s1712_s9, 0 }
  0x82   : > { %1594 = dma.done.wait (%p2113_p11), [#allocation6], 640   ;;  %p2114_p8 = pmov %p2113_p11 }
  0x84   : > { %1596 = vsyncadd (%p2114_p8), [#allocation6], 4294966656  ;;  %p2115_p13 = pmov %p2114_p8 }
  0x85   : > { %p2116_p6 = pmov %p2114_p8 }
  0x86   : > { %1598 = dma.done.wait (%p2115_p13), [#allocation9], 512  }
  0x87   : > { %1600 = vsyncadd (%p2116_p6), [#allocation9], 4294966784  ;;  %v1908_v0 = vld [vmem:[%s326_s20] sm:$0xff]  ;;  %vm384_vm0 = vcmask 261120   ;;  %v400_v3 = vld [vmem:[#allocation5] sm:$0xff]  ;;  %v1631_v6 = vmov 0.0|0.0   ;;  %v479_v42 = vlaneseq }
  0x88   : > { %v383_v1 = vmul.f32 %v1908_v0, %v1908_v0  ;;  %v401_v4 = vld [vmem:[#allocation5 + $0x8] sm:$0xff]  ;;  %v402_v5 = vld [vmem:[#allocation5 + $0x10] sm:$0xff]  ;;  %1252 = vmatprep.subr.bf16.mxu0 %v1631_v6  ;;  %v403_v8 = vld [vmem:[#allocation5 + $0x18] sm:$0xff]  ;;  %vm1632_vm1 = vmmov 0   ;;  %v1633_v9 = vmov 0.0   ;;  %s1634_s15 = smov 104  }
  0x89   : > { %v1253_v7 = vpack.c.bf16 %v401_v4, %v400_v3  ;;  %1218 = vmatprep.mubr.msk.f32.mxu0 %vm1632_vm1, %v1633_v9  ;;  %1221 = vmatprep.subr.mxu1 %v1633_v9  ;;  %v1256_v10 = vpack.c.bf16 %v403_v8, %v402_v5  ;;  %v1175_v15 = vld [vmem:[%s2087_s1] ss:$0 sm:$0xff]  ;;  %s1635_s18 = smov 88   ;;  %s1636_s21 = smov 32   ;;  %vm493_vm2 = vcmask 64512   ;;  %v478_v23 = vld [vmem:[#allocation7] sm:$0xff] }
  0x8a   : > { %v385_v2 = vsel %vm384_vm0, %v383_v1, 0.0  ;;  %1223 = vmatprep.mubr.msk.f32.mxu1 %vm1632_vm1, %v1633_v9  ;;  %v477_v18 = vld [vmem:[%s2089_s3] sm:$0xff]  ;;  %s1637_s24 = smov 120   ;;  %s1638_s22 = smov 16   ;;  %vm510_vm3 = vcmask 130048   ;;  %v480_v43 = vshrl.u32 %v479_v42, 7 }
  0x8b   : > { %386 = vadd.xlane.f32.xlu0 %v385_v2  ;;  %1254 = vmatpush3.bf16.msra.mxu0 %v1253_v7  ;;  %s1639_s17 = smov 8   ;;  %s1640_s16 = smov 96   ;;  %v482_v44 = vand.u32 127, %v479_v42 }
  0x8c   : > { %1255 = vmatprep.subr.bf16.mxu0 %v1631_v6  ;;  %s373_s25 = scalar_lea.vmem [#allocation11], %s1892_s10  ;;  %s1641_s20 = smov 80  }
  0x8d   : > { %vm483_vm4 = vcmp.le.s32.totalorder %v482_v44, %v480_v43  ;;  %s380_s11 = scalar_lea.vmem [#allocation13], %s1892_s10  ;;  %s1642_s13 = smov 112  }
  0x8e   : > { %s954_s14 = sand.u32 1, %s1712_s9   ;;  %s1981_s19 = sshll.u32 %s1712_s9, 7 }
  0x8f   : > { %1257 = vmatpush3.bf16.msra.mxu0 %v1256_v10  ;;  %s1643_s9 = smov [#allocation11]  }
  0x90   : > { %1258 = vmatprep.subr.bf16.mxu0 %v1631_v6 }
 0x118   : > { %v387_v11 = vpop.xlane.xlu0 %386 }
 0x119   : > { %v389_v12 = vmul.f32 0.03125, %v387_v11 }
 0x11b   : > { %v390_v13 = vadd.f32 1e-06, %v389_v12 }
 0x11d   : > { %1365 = vrsqrt.f32 %v390_v13 }
 0x127   : > { %v1366_v14 = vpop.eup %1365 }
 0x128   : > { %v392_v16 = vmul.f32 %v1366_v14, %v1908_v0 }
 0x12a   : > { %v399_v17 = vmul.f32 %v1175_v15, %v392_v16 }
 0x12c   : > { %1219 = vmatmul.mubr.msk.f32.vlgmr.msra.gmra.mrb[0].mxu0 %vm384_vm0, %v399_v17  ;;  %v870_v17 = vld [vmem:[#allocation8] sm:$0xff] }
 0x12d   : > { %1249 = vmatprep.mubr.msk.f32.mxu0 %vm1632_vm1, %v1633_v9 }
 0x1ff   : > { %v1931_v19 = vpop.f32.mrb[0].mxu0 }
 0x200   : > { %490 = vrot.lane.b32.xlu1 %v1931_v19, %s1634_s15  ;;  %v1220_v20 = vpop.f32.mrb[1].mxu0  ;;  %v484_v21 = vsub.f32 0.0, %v1931_v19  ;;  %v523_v22 = vmul.f32 %v477_v18, %v1931_v19 }
 0x202   : > { %486 = vrot.lane.b32.xlu0 %v484_v21, %s1635_s18 }
 0x204   : > { %496 = vrot.lane.b32.xlu1 %v477_v18, %s1636_s21 }
 0x206   : > { %690 = vrot.lane.b32.xlu0 %v1931_v19, %s1637_s24 }
 0x20a   : > { %694 = vrot.lane.b32.xlu0 %v477_v18, %s1638_s22  ;;  %v871_v18 = vld [vmem:[#allocation8 + $0x8] sm:$0xff] }
 0x20b   : > { %v1259_v20 = vpack.c.bf16 %v871_v18, %v870_v17 }
 0x20d   : > { %1260 = vmatpush3.bf16.msra.mxu0 %v1259_v20 }
 0x20e   : > { %1261 = vmatprep.subr.bf16.mxu0 %v1631_v6 }
 0x272   : > { %v491_v24 = vpop.permute.xlu1 %490 }
 0x274   : > { %v487_v25 = vpop.permute.xlu0 %486 }
 0x275   : > { %v494_v26 = vsel %vm493_vm2, %v487_v25, %v491_v24 }
 0x276   : > { %v500_v27 = vmul.f32 %v494_v26, %v478_v23  ;;  %v497_v28 = vpop.permute.xlu1 %496 }
 0x277   : > { %v499_v29 = vmul.f32 %v497_v28, %v1931_v19 }
 0x278   : > { %502 = vrot.lane.b32.xlu1 %v500_v27, %s1636_s21  ;;  %v691_v38 = vpop.permute.xlu0 %690  ;;  %s1987_s21 = scalar_lea.hbm %s2093_s7, %s1981_s19 }
 0x27c   : > { %516 = vrot.lane.b32.xlu1 %v484_v21, %s1637_s24  ;;  %v695_v56 = vpop.permute.xlu0 %694  ;;  %s986_s24 = sshll.u32 %s373_s25, 4  ;;  %s987_s24 = int_to_ptr.vmem [resolvable:$true] %s986_s24 }
 0x27d   : > { %v697_v58 = vmul.f32 %v695_v56, %v1931_v19 }
 0x280   : > { %519 = vrot.lane.b32.xlu1 %v1931_v19, %s1639_s17  ;;  %s1993_s17 = sshll.u32 %s380_s11, 4  ;;  %s1000_s17 = int_to_ptr.vmem [resolvable:$true] %s1993_s17 }
 0x2ea   : > { %v503_v30 = vpop.permute.xlu1 %502 }
 0x2eb   : > { %v505_v31 = vadd.f32 %v503_v30, %v499_v29 }
 0x2ed   : > { %507 = vrot.lane.b32.xlu1 %v505_v31, %s1640_s16  ;;  %s1489_s16 = scalar_lea.vmem %s987_s24, 128 }
 0x2ee   : > { %v517_v32 = vpop.permute.xlu1 %516  ;;  %p1490_p10 = scmp.ne.s32.totalorder %s987_s24, %s1489_s16 }
 0x2f0   : > { %p1491_p3 = pnand %p1490_p10, %p1844_p5 }
 0x2f1   : > { %687 = vrot.lane.b32.xlu1 %v484_v21, %s1634_s15  ;;  %v873_v21 = vld [vmem:[#allocation8 + $0x18] sm:$0xff] }
 0x2f2   : > { %v520_v33 = vpop.permute.xlu1 %519  ;;  %p1492_p7 = pneg %p1491_p3 }
 0x2f3   : > { %v522_v34 = vsel %vm493_vm2, %v517_v32, %v520_v33 }
 0x2f4   : > { %v524_v35 = vmul.f32 %v522_v34, %v478_v23 }
 0x2f6   : > { %v525_v37 = vadd.f32 %v524_v35, %v523_v22 }
 0x35f   : > { %v508_v36 = vpop.permute.xlu1 %507 }
 0x360   : > { %511 = vst.msk [vmem:[%s373_s25] sm:$0xff] %vm510_vm3, %v508_v36  ;;  %1222 = vmatpush3.xpose.msk.msra.mxu1 %vm510_vm3, %v508_v36 }
 0x361   : > { %1226 = vmatprep.subr.mxu1 %v1633_v9 }
 0x363   : > { %1224 = vmatmul.mubr.msk.f32.vlgmr.msra.gmra.mrb[0].mxu1 %vm510_vm3, %v525_v37  ;;  %v688_v39 = vpop.permute.xlu1 %687 }
 0x364   : > { %v693_v40 = vsel %vm493_vm2, %v688_v39, %v691_v38  ;;  %1228 = vmatprep.mubr.msk.f32.mxu1 %vm1632_vm1, %v1633_v9 }
 0x365   : > { %v698_v41 = vmul.f32 %v693_v40, %v478_v23 }
 0x367   : > { %700 = vrot.lane.b32.xlu0 %v698_v41, %s1638_s22 }
 0x3d9   : > { %v701_v57 = vpop.permute.xlu0 %700 }
 0x3da   : > { %v703_v59 = vadd.f32 %v701_v57, %v697_v58 }
 0x436   : > { %v597_v45 = vpop.f32.mrb[0].mxu1 }
 0x437   : > { %v601_v46 = vmul.f32 0.25, %v597_v45  ;;  %v1225_v47 = vpop.f32.mrb[1].mxu1 }
 0x439   : > { %v602_v48 = vsel %vm483_vm4, %v601_v46, -1e+30 }
 0x43a   : > { %v603_v49 = vsel %vm493_vm2, %v602_v48, -inf }
 0x43b   : > { %604 = vmax.xlane.f32.xlu1 %v603_v49 }
 0x44c   : > { %512 = vrot.lane.b32.xlu1 %v1931_v19, %s1641_s20  ;;  %v872_v19 = vld [vmem:[#allocation8 + $0x10] sm:$0xff]  ;;  %s1493_s20 = sshll.u32 %s1643_s9, 4  ;;  %s1494_s20 = int_to_ptr.vmem [resolvable:$false] %s1493_s20 }
 0x44d   : > { %v1262_v22 = vpack.c.bf16 %v873_v21, %v872_v19  ;;  %p1496_p12 = scmp.lt.s32.totalorder %s987_s24, %s1494_s20 }
 0x44f   : > { %1263 = vmatpush3.bf16.msra.mxu0 %v1262_v22 }
 0x4c8   : > { %v605_v50 = vpop.xlane.xlu1 %604 }
 0x4c9   : > { %v606_v51 = vsub.f32 %v602_v48, %v605_v50 }
 0x4cb   : > { %v607_v52 = vmul.f32 1.442695, %v606_v51 }
 0x4cc   : > { %v513_v53 = vpop.permute.xlu1 %512 }
 0x4cd   : > { %1367 = vpow2.f32 %v607_v52  ;;  %515 = vst.msk [vmem:[%s380_s11] sm:$0xff] %vm510_vm3, %v513_v53  ;;  %1227 = vmatpush3.msra.mxu1 %v513_v53 }
 0x4ce   : > { %1231 = vmatprep.subr.mxu1 %v1633_v9 }
 0x4d7   : > { %v1368_v54 = vpop.eup %1367 }
 0x4d8   : > { %v609_v55 = vsel %vm493_vm2, %v1368_v54, 0.0 }
 0x4d9   : > { %610 = vadd.xlane.f32.xlu0 %v609_v55 }
 0x4ef   : > { %705 = vrot.lane.b32.xlu0 %v703_v59, %s1642_s13  ;;  %s1495_s13 = scalar_lea.vmem %s1494_s20, 256 }
 0x4f0   : > { %p1497_p1 = scmp.lt.s32.totalorder %s1495_s13, %s1489_s16 }
 0x4f2   : > { %p1498_p2 = por %p1497_p1, %p1496_p12 }
 0x4f4   : > { %p1499_p4 = pnand %p1498_p2, %p1492_p7 }
 0x566   : > { %v611_v60 = vpop.xlane.xlu0 %610 }
 0x567   : > { %1369 = vrcp.f32 %v611_v60 }
 0x56a   : > { %v706_v63 = vpop.permute.xlu0 %705 }
 0x571   : > { %v1370_v61 = vpop.eup %1369 }
 0x572   : > { %v613_v62 = vmul.f32 %v1370_v61, %v1368_v54 }
 0x574   : > { %1229 = vmatmul.mubr.msk.f32.vlgmr.msra.gmra.mrb[2].mxu1 %vm493_vm2, %v613_v62 }
 0x575   : > { %1232 = vmatpush3.xpose.msk.msra.mxu1 %vm510_vm3, %v508_v36  ;;  %1233 = vmatprep.mubr.msk.f32.mxu1 %vm1632_vm1, %v1633_v9 }
 0x576   : > { %1236 = vmatprep.subr.mxu1 %v1633_v9 }
 0x578   : > { %1234 = vmatmul.mubr.msk.f32.vlgmr.msra.gmra.mrb[4].mxu1 %vm510_vm3, %v706_v63 }
 0x579   : > { %1237 = vmatpush3.msra.mxu1 %v513_v53  ;;  %1238 = vmatprep.mubr.msk.f32.mxu1 %vm1632_vm1, %v1633_v9 }
 0x647   : > { %v683_v1 = vpop.f32.mrb[2].mxu1 }
 0x648   : > { %v1230_v2 = vpop.f32.mrb[3].mxu1 }
 0x64b   : > { %v775_v3 = vpop.f32.mrb[4].mxu1 }
 0x64c   : > { %v779_v4 = vmul.f32 0.25, %v775_v3  ;;  %v1235_v5 = vpop.f32.mrb[5].mxu1 }
 0x64e   : > { %v780_v7 = vsel %vm483_vm4, %v779_v4, -1e+30 }
 0x64f   : > { %v781_v8 = vsel %vm493_vm2, %v780_v7, -inf }
 0x650   : > { %782 = vmax.xlane.f32.xlu1 %v781_v8 }
 0x6dd   : > { %v783_v10 = vpop.xlane.xlu1 %782 }
 0x6de   : > { %v784_v11 = vsub.f32 %v780_v7, %v783_v10 }
 0x6e0   : > { %v785_v12 = vmul.f32 1.442695, %v784_v11 }
 0x6e2   : > { %1371 = vpow2.f32 %v785_v12 }
 0x6ec   : > { %v1372_v13 = vpop.eup %1371 }
 0x6ed   : > { %v787_v14 = vsel %vm493_vm2, %v1372_v13, 0.0 }
 0x6ee   : > { %788 = vadd.xlane.f32.xlu0 %v787_v14 }
 0x77b   : > { %v789_v15 = vpop.xlane.xlu0 %788 }
 0x77c   : > { %1373 = vrcp.f32 %v789_v15 }
 0x786   : > { %v1374_v9 = vpop.eup %1373 }
 0x787   : > { %v791_v16 = vmul.f32 %v1374_v9, %v1372_v13 }
 0x789   : > { %1239 = vmatmul.mubr.msk.f32.vlgmr.msra.gmra.mrb[6].mxu1 %vm493_vm2, %v791_v16 }
 0x85c   : > { %v861_v23 = vpop.f32.mrb[6].mxu1 }
 0x85d   : > { %866 = vrot.lane.b32.xlu1 %v861_v23, %s1638_s22  ;;  %v1240_v24 = vpop.f32.mrb[7].mxu1  ;;  %s1995_s22 = scalar_lea.sflag [#allocation12], %s954_s14 }
 0x8cf   : > { %v867_v25 = vpop.permute.xlu1 %866 }
 0x8d0   : > { %v869_v26 = vsel %vm510_vm3, %v683_v1, %v867_v25 }
 0x8d1   : > { %1250 = vmatmul.mubr.msk.f32.vlgmr.msra.gmra.mrb[2].mxu0 %vm384_vm0, %v869_v26 }
 0x8d2   : > { %1502 = shalt.err (!%p1499_p4)
}
 0x8d3   : > { %s1503_s25 = scalar_lea.hbm %s1987_s21, 128  ;;  %s1507_s15 = scalar_lea.hbm %s2093_s7, 256 }
 0x8d4   : > { %p1504_p0 = scmp.ne.s32.totalorder %s1987_s21, %s1503_s25  ;;  %p1508_p8 = scmp.lt.u32.totalorder %s1987_s21, %s2093_s7 }
 0x8d5   : > { %p1509_p13 = scmp.lt.u32.totalorder %s1507_s15, %s1503_s25  ;;  %p1511_p10 = scmp.lt.u32.totalorder %s1503_s25, %s1987_s21 }
 0x8d6   : > { %p1505_p9 = pnand %p1504_p0, %p1844_p5 }
 0x8d7   : > { %p1510_p6 = por %p1509_p13, %p1508_p8 }
 0x8d8   : > { %p1506_p11 = pneg %p1505_p9 }
 0x8d9   : > { %p1512_p3 = por %p1511_p10, %p1510_p6 }
 0x8db   : > { %p1513_p7 = pnand %p1512_p3, %p1506_p11 }
 0x8dd   : > { %1516 = shalt.err (!%p1513_p7)
}
 0x8de   : > { %1279 = dma.vmem_to_hbm [thread:$0]  (%p1844_p5), %s987_s24, 128, %s1987_s21, %s1995_s22  }
 0x8df   : > { %s997_s13 = scalar_lea.hbm %s2094_s8, %s1981_s19  ;;  %s1517_s11 = scalar_lea.vmem %s1000_s17, 128 }
 0x8e0   : > { %p1518_p12 = scmp.ne.s32.totalorder %s1000_s17, %s1517_s11  ;;  %s1644_s25 = smov [#allocation13]  }
 0x8e1   : > { %s1521_s14 = sshll.u32 %s1644_s25, 4  ;;  %s1522_s14 = int_to_ptr.vmem [resolvable:$false] %s1521_s14 }
 0x8e2   : > { %p1519_p1 = pnand %p1518_p12, %p1844_p5  ;;  %s1523_s15 = scalar_lea.vmem %s1522_s14, 256 }
 0x8e3   : > { %p1524_p4 = scmp.lt.s32.totalorder %s1000_s17, %s1522_s14  ;;  %p1525_p0 = scmp.lt.s32.totalorder %s1523_s15, %s1517_s11 }
 0x8e4   : > { %p1520_p2 = pneg %p1519_p1 }
 0x8e5   : > { %p1526_p9 = por %p1525_p0, %p1524_p4 }
 0x8e7   : > { %p1527_p11 = pnand %p1526_p9, %p1520_p2 }
 0x8e9   : > { %1530 = shalt.err (!%p1527_p11)
}
 0x8ea   : > { %s1531_s21 = scalar_lea.hbm %s997_s13, 128  ;;  %s1535_s9 = scalar_lea.hbm %s2094_s8, 256 }
 0x8eb   : > { %p1532_p8 = scmp.ne.s32.totalorder %s997_s13, %s1531_s21  ;;  %p1536_p10 = scmp.lt.u32.totalorder %s997_s13, %s2094_s8 }
 0x8ec   : > { %p1537_p3 = scmp.lt.u32.totalorder %s1535_s9, %s1531_s21  ;;  %p1539_p12 = scmp.lt.u32.totalorder %s1531_s21, %s997_s13 }
 0x8ed   : > { %p1533_p13 = pnand %p1532_p8, %p1844_p5 }
 0x8ee   : > { %p1538_p7 = por %p1537_p3, %p1536_p10 }
 0x8ef   : > { %p1534_p6 = pneg %p1533_p13 }
 0x8f0   : > { %p1540_p1 = por %p1539_p12, %p1538_p7 }
 0x8f2   : > { %p1541_p2 = pnand %p1540_p1, %p1534_p6 }
 0x8f4   : > { %1544 = shalt.err (!%p1541_p2)
}
 0x8f5   : > { %1280 = dma.vmem_to_hbm [thread:$0]  (%p1844_p5), %s1000_s17, 128, %s997_s13, %s1995_s22  }
 0x8f6   : > { %s366_s11 = scalar_lea.vmem [#allocation10], %s1892_s10  ;;  %s2039_s21 = scalar_lea.hbm %s2092_s6, %s1981_s19 }
 0x8f7   : > { %s973_s25 = sshll.u32 %s366_s11, 4  ;;  %s950_s24 = scalar_lea.sflag [#allocation4], %s1889_s27  ;;  %s2041_s25 = int_to_ptr.vmem [resolvable:$true] %s973_s25 }
 0x8f8   : > { %s1545_s17 = scalar_lea.vmem %s2041_s25, 128  ;;  %s1645_s10 = smov [#allocation10]  }
 0x8f9   : > { %p1546_p4 = scmp.ne.s32.totalorder %s2041_s25, %s1545_s17  ;;  %s1549_s22 = sshll.u32 %s1645_s10, 4  ;;  %s1550_s22 = int_to_ptr.vmem [resolvable:$false] %s1549_s22 }
 0x8fa   : > { %s1551_s13 = scalar_lea.vmem %s1550_s22, 256  ;;  %p1552_p11 = scmp.lt.s32.totalorder %s2041_s25, %s1550_s22 }
 0x8fb   : > { %p1547_p0 = pnand %p1546_p4, %p1844_p5  ;;  %p1553_p8 = scmp.lt.s32.totalorder %s1551_s13, %s1545_s17 }
 0x8fd   : > { %p1548_p9 = pneg %p1547_p0  ;;  %p1554_p13 = por %p1553_p8, %p1552_p11 }
 0x8ff   : > { %p1555_p6 = pnand %p1554_p13, %p1548_p9 }
 0x9a4   : > { %v943_v6 = vpop.f32.mrb[2].mxu0 }
 0x9a5   : > { %v947_v27 = vadd.f32 %v943_v6, %v1908_v0  ;;  %v1251_v28 = vpop.f32.mrb[3].mxu0 }
 0x9a7   : > { %948 = vst.msk [vmem:[%s366_s11] sm:$0xff] %vm384_vm0, %v947_v27 }
 0x9a8   : > { %1558 = shalt.err (!%p1555_p6)
}
 0x9a9   : > { %s1559_s27 = scalar_lea.hbm %s2039_s21, 128  ;;  %s1563_s9 = scalar_lea.hbm %s2092_s6, 256 }
 0x9aa   : > { %p1560_p10 = scmp.ne.s32.totalorder %s2039_s21, %s1559_s27  ;;  %p1564_p12 = scmp.lt.u32.totalorder %s2039_s21, %s2092_s6 }
 0x9ab   : > { %p1565_p1 = scmp.lt.u32.totalorder %s1563_s9, %s1559_s27  ;;  %p1567_p4 = scmp.lt.u32.totalorder %s1559_s27, %s2039_s21 }
 0x9ac   : > { %p1561_p3 = pnand %p1560_p10, %p1844_p5 }
 0x9ad   : > { %p1566_p2 = por %p1565_p1, %p1564_p12 }
 0x9ae   : > { %p1562_p7 = pneg %p1561_p3 }
 0x9af   : > { %p1568_p0 = por %p1567_p4, %p1566_p2 }
 0x9b1   : > { %p1569_p9 = pnand %p1568_p0, %p1562_p7 }
 0x9b3   : > { %1572 = shalt.err (!%p1569_p9)
}
 0x9b4   : > { %1278 = dma.vmem_to_hbm [thread:$0]  (%p1844_p5), %s2041_s25, 128, %s2039_s21, %s950_s24  }
 0x9b5 PF: > { %s2117_s11 = sld [smem:[#allocation19_spill]]  ;;  %s2118_s14 = sld [smem:[#allocation20_spill]] }
 0x9b6   : > { %p2120_p8 = scmp.ge.s32.totalorder %s1623_s30, 2 }
 0x9bb   : > { %s1011_s15 = sand.u32 1, %s2117_s11   ;;  %p2119_p11 = scmp.ne.s32.totalorder %s2118_s14, 0 }
 0x9bc   : > { %s1012_s17 = scalar_lea.sflag [#allocation4], %s1011_s15 }
 0x9bd   : > { %p1299_p13 = pnand %p2120_p8, %p2119_p11 }
 0x9bf   : > { %1602 = dma.done.wait (!%p1299_p13), %s1012_s17, 128  }
 0x9c0   : > { %1604 = vsyncadd (!%p1299_p13), %s1012_s17, 4294967168  ;;  %s2121_s10 = sadd.s32 4294967294, %s1623_s30  }
 0x9c1   : > { %s1020_s22 = sand.u32 1, %s2121_s10  }
 0x9c2   : > { %s1021_s13 = scalar_lea.sflag [#allocation12], %s1020_s22 }
 0x9c3   : > { %1606 = dma.done.wait (!%p1299_p13), %s1021_s13, 256  }
 0x9c4   : > { %1608 = vsyncadd (!%p1299_p13), %s1021_s13, 4294967040  ;;  %p27_p5 = scmp.ge.s32.totalorder %s1830_s26, 4   ;;  %s2122_s27 = smov %s1615_s28 }
 0x9c5   : > { %s2123_s28 = smov %s1619_s29  ;;  %s2124_s29 = smov %s1840_s12 }
 0x9c6   : > { %s2125_s30 = smov %s1830_s26  ;;  %29 = sbr.rel (!%p27_p5) target bundleno = 9 (0x9), region = 133 }
 0x9cd   :  { %1035 = vsyncpa [#allocation3], 1 }
 0x9ce   :  { %1037 = vsyncpa [#allocation3 + $0x1], 1 }
 0x9cf   :  { %1038 = vsyncpa [#allocation6], 1 }
 0x9d0   :  { %1039 = vsyncpa [#allocation9], 1 }
 0x9d1   :  { %1040 = vsyncpa [#allocation4], 1 }
 0x9d2   :  { %1042 = vsyncpa [#allocation4 + $0x1], 1 }
 0x9d3   :  { %1043 = vsyncpa [#allocation12], 1 }
 0x9d4   :  { %1045 = vsyncpa [#allocation12 + $0x1], 1 }

</bundles_post_ra>
